<compile_context>
chip_gen: v6e
topology: v6e:2x2x1
jax: 0.10.0
libtpu: 0.0.40
codegen_flags: <defaults>
</compile_context>

<pallas_src>
import functools

import jax
import jax.numpy as jnp
import numpy as np
from jax.experimental import pallas as pl
from jax.experimental.pallas import tpu as pltpu


def _selflabel_loss_kernel(anchor_ref, aug_ref, ce_out_ref, cnt_out_ref, *,
                           confidence, valid_rows, rows_per_block):
    i = pl.program_id(1)

    @pl.when(i == 0)
    def _init():
        ce_out_ref[...] = jnp.zeros_like(ce_out_ref)
        cnt_out_ref[...] = jnp.zeros_like(cnt_out_ref)

    # Upcast inside the kernel (inputs may arrive as bf16 over HBM).
    a = anchor_ref[...].astype(jnp.float32)        # (tb, n_cls) anchor logits
    g = aug_ref[...].astype(jnp.float32)           # (tb, n_cls) augmented logits
    tb, n_cls = a.shape

    col = jax.lax.broadcasted_iota(jnp.int32, (tb, n_cls), 1)

    # --- softmax max-prob and argmax (first max index, like torch.max) ------
    a_max = jnp.max(a, axis=1, keepdims=True)                       # (tb, 1)
    denom = jnp.sum(jnp.exp(a - a_max), axis=1, keepdims=True)      # (tb, 1)
    max_prob = 1.0 / denom          # exact divide: threshold is sensitive
    target = jnp.min(jnp.where(a == a_max, col, n_cls), axis=1,
                     keepdims=True)                                 # (tb, 1)

    maskf = (max_prob > confidence).astype(jnp.float32)             # (tb, 1)
    if valid_rows is not None:
        # Batch was zero-padded in the wrapper; drop the padded rows.
        row0 = (pl.program_id(0) * pl.num_programs(1) + i) * rows_per_block
        rows = row0 + jax.lax.broadcasted_iota(jnp.int32, (tb, 1), 0)
        maskf = maskf * (rows < valid_rows).astype(jnp.float32)

    onehot = (col == target).astype(jnp.float32)                    # (tb, n_cls)

    # --- per-sample cross entropy on aug_logits ------------------------------
    g_max = jnp.max(g, axis=1, keepdims=True)
    lse = g_max + jnp.log(jnp.sum(jnp.exp(g - g_max), axis=1, keepdims=True))
    g_t = jnp.sum(g * onehot, axis=1, keepdims=True)
    ce = lse - g_t                                                  # (tb, 1)

    # --- per-class accumulation (global reduction across all batch tiles) ----
    sel = maskf * onehot                                            # (tb, n_cls)
    tile_ce = jnp.sum(sel * ce, axis=0, keepdims=True)              # (1, n_cls)
    tile_cnt = jnp.sum(sel, axis=0, keepdims=True)                  # (1, n_cls)
    ce_out_ref[...] += tile_ce[None]                                # (1,1,n_cls)
    cnt_out_ref[...] += tile_cnt[None]


def selflabel_loss(anchor_logits, aug_logits, confidence=0.99,
                   block_rows=512, num_core_splits=2):
    bs, n_cls = anchor_logits.shape
    assert aug_logits.shape == (bs, n_cls)

    def _round_up(x, m):
        return ((x + m - 1) // m) * m

    # Batch tile: multiple of 32 rows (covers f32/bf16/int8 sublane packing),
    # capped by block_rows. Target >= 512 rows for real batches.
    tb = min(_round_up(block_rows, 32), _round_up(bs, 32))

    n_tiles = pl.cdiv(bs, tb)
    n_splits = num_core_splits if n_tiles >= num_core_splits else 1
    tiles_per_split = pl.cdiv(n_tiles, n_splits)
    padded_bs = n_splits * tiles_per_split * tb

    if padded_bs != bs:
        pad = padded_bs - bs
        # Zero-padded rows are additionally masked out by the in-kernel
        # row-validity check, so their contents never matter.
        anchor_logits = jnp.pad(anchor_logits, ((0, pad), (0, 0)))
        aug_logits = jnp.pad(aug_logits, ((0, pad), (0, 0)))

    kernel = functools.partial(
        _selflabel_loss_kernel,
        confidence=float(confidence),
        valid_rows=(bs if padded_bs != bs else None),
        rows_per_block=tb,
    )

    def in_map(c, i):
        return (c * tiles_per_split + i, 0)

    ce_sums, counts = pl.pallas_call(
        kernel,
        out_shape=(
            jax.ShapeDtypeStruct((n_splits, 1, n_cls), jnp.float32),
            jax.ShapeDtypeStruct((n_splits, 1, n_cls), jnp.float32),
        ),
        grid=(n_splits, tiles_per_split),
        in_specs=[
            pl.BlockSpec((tb, n_cls), in_map),   # native dtype: no wrapper cast
            pl.BlockSpec((tb, n_cls), in_map),
        ],
        out_specs=(
            pl.BlockSpec((1, 1, n_cls), lambda c, i: (c, 0, 0)),
            pl.BlockSpec((1, 1, n_cls), lambda c, i: (c, 0, 0)),
        ),
        compiler_params=pltpu.CompilerParams(
            dimension_semantics=("parallel", "arbitrary")),
    )(anchor_logits, aug_logits)

    # Tiny epilogue in plain JAX: global weighted mean over all tiles/splits.
    counts = jnp.sum(counts, axis=(0, 1))                   # (n_cls,)
    ce_sums = jnp.sum(ce_sums, axis=(0, 1))                 # (n_cls,)
    n_present = jnp.sum((counts > 0.0).astype(jnp.float32))
    per_class = ce_sums / jnp.maximum(counts, 1.0)
    # 0 / 0 -> NaN when no sample is confident, matching PyTorch.
    return jnp.sum(per_class) / n_present


def _reference_loss(anchor, aug, confidence):
    """Pure numpy reference following the PyTorch code path exactly."""
    a = np.asarray(anchor, np.float64)
    g = np.asarray(aug, np.float64)
    n_cls = a.shape[1]
    e = np.exp(a - a.max(1, keepdims=True))
    probs = e / e.sum(1, keepdims=True)
    max_prob = probs.max(1)
    target = probs.argmax(1)
    mask = max_prob > confidence
    t = target[mask]
    x = g[mask]
    if t.size == 0:
        return float("nan")
    idx, cnts = np.unique(t, return_counts=True)
    weight = np.ones(n_cls)
    weight[idx] = t.size / cnts.astype(np.float64)
    xm = x.max(1, keepdims=True)
    lse = np.log(np.exp(x - xm).sum(1)) + xm[:, 0]
    ce = lse - x[np.arange(t.size), t]
    w = weight[t]
    return float((w * ce).sum() / w.sum())


if __name__ == "__main__":
    keys = jax.random.split(jax.random.PRNGKey(0), 6)
    confidence = 0.99

    # ---- Test 1: small f32 batch (single tile, padded to 32 rows) ----------
    bs, n_cls = 8, 10
    anchor = jax.random.normal(keys[0], (bs, n_cls), jnp.float32) * 2.0
    peak_cls = jax.random.randint(keys[2], (bs,), 0, n_cls)
    boost = (jnp.arange(bs) % 2 == 0).astype(jnp.float32) * 20.0
    anchor = anchor + boost[:, None] * jax.nn.one_hot(peak_cls, n_cls,
                                                      dtype=jnp.float32)
    aug = jax.random.normal(keys[1], (bs, n_cls), jnp.float32) * 2.0

    loss1 = jax.block_until_ready(selflabel_loss(anchor, aug, confidence))
    ref1 = _reference_loss(np.asarray(anchor), np.asarray(aug), confidence)
    assert np.isclose(float(loss1), ref1, rtol=1e-4, atol=1e-5), (float(loss1), ref1)

    # ---- Test 2: bf16 inputs, multi-tile grid with megacore split ----------
    bs2, n_cls2 = 300, 16
    anchor2 = jax.random.normal(keys[3], (bs2, n_cls2), jnp.float32) * 2.0
    peak2 = jax.random.randint(keys[5], (bs2,), 0, n_cls2)
    boost2 = (jnp.arange(bs2) % 3 == 0).astype(jnp.float32) * 25.0
    anchor2 = anchor2 + boost2[:, None] * jax.nn.one_hot(peak2, n_cls2,
                                                         dtype=jnp.float32)
    aug2 = jax.random.normal(keys[4], (bs2, n_cls2), jnp.float32) * 2.0
    anchor2_bf16 = anchor2.astype(jnp.bfloat16)
    aug2_bf16 = aug2.astype(jnp.bfloat16)

    loss2 = jax.block_until_ready(
        selflabel_loss(anchor2_bf16, aug2_bf16, confidence, block_rows=64))
    ref2 = _reference_loss(np.asarray(anchor2_bf16.astype(jnp.float32)),
                           np.asarray(aug2_bf16.astype(jnp.float32)),
                           confidence)
    assert np.isclose(float(loss2), ref2, rtol=1e-4, atol=1e-4), (float(loss2), ref2)

    # ---- Test 3: empty-mask case -> NaN (PyTorch parity) --------------------
    loss3 = jax.block_until_ready(selflabel_loss(anchor, aug, confidence=1.5))
    ref3 = _reference_loss(np.asarray(anchor), np.asarray(aug), 1.5)
    assert np.isnan(float(loss3)) and np.isnan(ref3), (float(loss3), ref3)

    print("KERNEL_OK")
</pallas_src>

<mosaic_0001>
module attributes {stable_mosaic.version = 11 : i64} {
  func.func @_selflabel_loss_kernel(%arg0: i32, %arg1: i32, %arg2: memref<32x10xf32, #tpu.memory_space<vmem>>, %arg3: memref<32x10xf32, #tpu.memory_space<vmem>>, %arg4: memref<1x1x10xf32, #tpu.memory_space<vmem>>, %arg5: memref<1x1x10xf32, #tpu.memory_space<vmem>>) attributes {dimension_semantics = [#tpu.dimension_semantics<parallel>, #tpu.dimension_semantics<arbitrary>], iteration_bounds = array<i64: 1, 1>, scalar_prefetch = 0 : i64, scratch_operands = 0 : i64, tpu.core_type = #tpu.core_type<tc>, window_params = [{transform_indices = @transform_0, window_bounds = array<i64: 32, 10>}, {transform_indices = @transform_1, window_bounds = array<i64: 32, 10>}, {transform_indices = @transform_2, window_bounds = array<i64: 1, 1, 10>}, {transform_indices = @transform_3, window_bounds = array<i64: 1, 1, 10>}]} {
    %c0_i32 = arith.constant 0 : i32
    %0 = arith.cmpi eq, %arg1, %c0_i32 : i32
    %1 = arith.extui %0 : i1 to i32
    %c0_i32_0 = arith.constant 0 : i32
    %2 = arith.cmpi ne, %1, %c0_i32_0 : i32
    scf.if %2 {
      %cst_25 = arith.constant 0.000000e+00 : f32
      %69 = vector.broadcast %cst_25 : f32 to vector<1x1x10xf32>
      %c0_26 = arith.constant 0 : index
      %c0_27 = arith.constant 0 : index
      %c0_28 = arith.constant 0 : index
      %70 = vector.load %arg4[%c0_26, %c0_27, %c0_28] : memref<1x1x10xf32, #tpu.memory_space<vmem>>, vector<1x1x10xf32>
      tpu.vector_store %arg4[%c0_26, %c0_27, %c0_28], %69 {strides = array<i32>} : memref<1x1x10xf32, #tpu.memory_space<vmem>>, vector<1x1x10xf32>,
      %cst_29 = arith.constant 0.000000e+00 : f32
      %71 = vector.broadcast %cst_29 : f32 to vector<1x1x10xf32>
      %c0_30 = arith.constant 0 : index
      %c0_31 = arith.constant 0 : index
      %c0_32 = arith.constant 0 : index
      %72 = vector.load %arg5[%c0_30, %c0_31, %c0_32] : memref<1x1x10xf32, #tpu.memory_space<vmem>>, vector<1x1x10xf32>
      tpu.vector_store %arg5[%c0_30, %c0_31, %c0_32], %71 {strides = array<i32>} : memref<1x1x10xf32, #tpu.memory_space<vmem>>, vector<1x1x10xf32>,
    } else {
    }
    %c0 = arith.constant 0 : index
    %c0_1 = arith.constant 0 : index
    %3 = vector.load %arg2[%c0, %c0_1] : memref<32x10xf32, #tpu.memory_space<vmem>>, vector<32x10xf32>
    %c0_2 = arith.constant 0 : index
    %c0_3 = arith.constant 0 : index
    %4 = vector.load %arg3[%c0_2, %c0_3] : memref<32x10xf32, #tpu.memory_space<vmem>>, vector<32x10xf32>
    %5 = tpu.iota {dimensions = array<i32: 1>} : vector<32x10xi32>
    %cst = arith.constant dense<0xFF800000> : vector<32xf32>
    %6 = vector.multi_reduction <maximumf>, %3, %cst [1] : vector<32x10xf32> to vector<32xf32>
    %7 = vector.shape_cast %6 : vector<32xf32> to vector<32x1xf32>
    %8 = vector.broadcast %7 : vector<32x1xf32> to vector<32x10xf32>
    %9 = arith.subf %3, %8 : vector<32x10xf32>
    %10 = math.exp %9 : vector<32x10xf32>
    %cst_4 = arith.constant dense<0.000000e+00> : vector<32xf32>
    %11 = vector.multi_reduction <add>, %10, %cst_4 [1] : vector<32x10xf32> to vector<32xf32>
    %12 = vector.shape_cast %11 : vector<32xf32> to vector<32x1xf32>
    %cst_5 = arith.constant 1.000000e+00 : f32
    %13 = vector.broadcast %cst_5 : f32 to vector<32x1xf32>
    %14 = arith.divf %13, %12 : vector<32x1xf32>
    %15 = vector.broadcast %7 : vector<32x1xf32> to vector<32x10xf32>
    %16 = arith.cmpf oeq, %3, %15 : vector<32x10xf32>
    %c10_i32 = arith.constant 10 : i32
    %17 = vector.broadcast %c10_i32 : i32 to vector<32x10xi32>
    %18 = arith.select %16, %5, %17 : vector<32x10xi1>, vector<32x10xi32>
    %cst_6 = arith.constant dense<2147483647> : vector<32xi32>
    %19 = vector.multi_reduction <minsi>, %18, %cst_6 [1] : vector<32x10xi32> to vector<32xi32>
    %20 = vector.shape_cast %19 : vector<32xi32> to vector<32x1xi32>
    %cst_7 = arith.constant 9.900000e-01 : f32
    %21 = vector.broadcast %cst_7 : f32 to vector<32x1xf32>
    %22 = arith.cmpf ogt, %14, %21 : vector<32x1xf32>
    %23 = arith.extui %22 : vector<32x1xi1> to vector<32x1xi32>
    %24 = arith.sitofp %23 : vector<32x1xi32> to vector<32x1xf32>
    %c1_i32 = arith.constant 1 : i32
    %25 = arith.muli %arg0, %c1_i32 : i32
    %26 = arith.addi %25, %arg1 : i32
    %c32_i32 = arith.constant 32 : i32
    %27 = arith.muli %26, %c32_i32 : i32
    %28 = tpu.iota {dimensions = array<i32: 0>} : vector<32x1xi32>
    %29 = vector.broadcast %27 : i32 to vector<32x1xi32>
    %30 = arith.addi %29, %28 : vector<32x1xi32>
    %c8_i32 = arith.constant 8 : i32
    %31 = vector.broadcast %c8_i32 : i32 to vector<32x1xi32>
    %32 = arith.cmpi slt, %30, %31 : vector<32x1xi32>
    %33 = arith.extui %32 : vector<32x1xi1> to vector<32x1xi32>
    %34 = arith.sitofp %33 : vector<32x1xi32> to vector<32x1xf32>
    %35 = arith.mulf %24, %34 : vector<32x1xf32>
    %36 = vector.broadcast %20 : vector<32x1xi32> to vector<32x10xi32>
    %37 = arith.cmpi eq, %5, %36 : vector<32x10xi32>
    %38 = arith.extui %37 : vector<32x10xi1> to vector<32x10xi32>
    %39 = arith.sitofp %38 : vector<32x10xi32> to vector<32x10xf32>
    %cst_8 = arith.constant dense<0xFF800000> : vector<32xf32>
    %40 = vector.multi_reduction <maximumf>, %4, %cst_8 [1] : vector<32x10xf32> to vector<32xf32>
    %41 = vector.shape_cast %40 : vector<32xf32> to vector<32x1xf32>
    %42 = vector.broadcast %41 : vector<32x1xf32> to vector<32x10xf32>
    %43 = arith.subf %4, %42 : vector<32x10xf32>
    %44 = math.exp %43 : vector<32x10xf32>
    %cst_9 = arith.constant dense<0.000000e+00> : vector<32xf32>
    %45 = vector.multi_reduction <add>, %44, %cst_9 [1] : vector<32x10xf32> to vector<32xf32>
    %46 = vector.shape_cast %45 : vector<32xf32> to vector<32x1xf32>
    %47 = math.log %46 : vector<32x1xf32>
    %48 = arith.addf %41, %47 : vector<32x1xf32>
    %49 = arith.mulf %4, %39 : vector<32x10xf32>
    %cst_10 = arith.constant dense<0.000000e+00> : vector<32xf32>
    %50 = vector.multi_reduction <add>, %49, %cst_10 [1] : vector<32x10xf32> to vector<32xf32>
    %51 = vector.shape_cast %50 : vector<32xf32> to vector<32x1xf32>
    %52 = arith.subf %48, %51 : vector<32x1xf32>
    %53 = vector.broadcast %35 : vector<32x1xf32> to vector<32x10xf32>
    %54 = arith.mulf %53, %39 : vector<32x10xf32>
    %55 = vector.broadcast %52 : vector<32x1xf32> to vector<32x10xf32>
    %56 = arith.mulf %54, %55 : vector<32x10xf32>
    %cst_11 = arith.constant dense<0.000000e+00> : vector<10xf32>
    %57 = vector.multi_reduction <add>, %56, %cst_11 [0] : vector<32x10xf32> to vector<10xf32>
    %58 = vector.shape_cast %57 : vector<10xf32> to vector<1x10xf32>
    %cst_12 = arith.constant dense<0.000000e+00> : vector<10xf32>
    %59 = vector.multi_reduction <add>, %54, %cst_12 [0] : vector<32x10xf32> to vector<10xf32>
    %60 = vector.shape_cast %59 : vector<10xf32> to vector<1x10xf32>
    %c0_13 = arith.constant 0 : index
    %c0_14 = arith.constant 0 : index
    %c0_15 = arith.constant 0 : index
    %61 = vector.load %arg4[%c0_13, %c0_14, %c0_15] : memref<1x1x10xf32, #tpu.memory_space<vmem>>, vector<1x1x10xf32>
    %62 = vector.shape_cast %58 : vector<1x10xf32> to vector<1x1x10xf32>
    %63 = arith.addf %61, %62 : vector<1x1x10xf32>
    %c0_16 = arith.constant 0 : index
    %c0_17 = arith.constant 0 : index
    %c0_18 = arith.constant 0 : index
    %64 = vector.load %arg4[%c0_16, %c0_17, %c0_18] : memref<1x1x10xf32, #tpu.memory_space<vmem>>, vector<1x1x10xf32>
    tpu.vector_store %arg4[%c0_16, %c0_17, %c0_18], %63 {strides = array<i32>} : memref<1x1x10xf32, #tpu.memory_space<vmem>>, vector<1x1x10xf32>,
    %c0_19 = arith.constant 0 : index
    %c0_20 = arith.constant 0 : index
    %c0_21 = arith.constant 0 : index
    %65 = vector.load %arg5[%c0_19, %c0_20, %c0_21] : memref<1x1x10xf32, #tpu.memory_space<vmem>>, vector<1x1x10xf32>
    %66 = vector.shape_cast %60 : vector<1x10xf32> to vector<1x1x10xf32>
    %67 = arith.addf %65, %66 : vector<1x1x10xf32>
    %c0_22 = arith.constant 0 : index
    %c0_23 = arith.constant 0 : index
    %c0_24 = arith.constant 0 : index
    %68 = vector.load %arg5[%c0_22, %c0_23, %c0_24] : memref<1x1x10xf32, #tpu.memory_space<vmem>>, vector<1x1x10xf32>
    tpu.vector_store %arg5[%c0_22, %c0_23, %c0_24], %67 {strides = array<i32>} : memref<1x1x10xf32, #tpu.memory_space<vmem>>, vector<1x1x10xf32>,
    return
  }
  func.func @transform_0(%arg0: i32, %arg1: i32) -> (i32, i32) {
    %c1_i32 = arith.constant 1 : i32
    %0 = arith.muli %arg0, %c1_i32 : i32
    %1 = arith.addi %0, %arg1 : i32
    %c0_i32 = arith.constant 0 : i32
    %c0_i32_0 = arith.constant 0 : i32
    return %1, %c0_i32 : i32, i32
  }
  func.func @transform_1(%arg0: i32, %arg1: i32) -> (i32, i32) {
    %c1_i32 = arith.constant 1 : i32
    %0 = arith.muli %arg0, %c1_i32 : i32
    %1 = arith.addi %0, %arg1 : i32
    %c0_i32 = arith.constant 0 : i32
    %c0_i32_0 = arith.constant 0 : i32
    return %1, %c0_i32 : i32, i32
  }
  func.func @transform_2(%arg0: i32, %arg1: i32) -> (i32, i32, i32) {
    %c0_i32 = arith.constant 0 : i32
    %c0_i32_0 = arith.constant 0 : i32
    %c0_i32_1 = arith.constant 0 : i32
    return %arg0, %c0_i32, %c0_i32_0 : i32, i32, i32
  }
  func.func @transform_3(%arg0: i32, %arg1: i32) -> (i32, i32, i32) {
    %c0_i32 = arith.constant 0 : i32
    %c0_i32_0 = arith.constant 0 : i32
    %c0_i32_1 = arith.constant 0 : i32
    return %arg0, %c0_i32, %c0_i32_0 : i32, i32, i32
  }
}

</mosaic_0001>

<bundles_post_ra>
// kernel: tpu_custom_call.1
= control target key start
LH: loop header
LB: loop body
LE: loop exit
PB: predicated region body
PF: predicated region fallthrough
CT: control target
= control target key end

     0   :  { %9 = vsyncpa [#allocation3], 0  ;;  %vm76_vm0 = vcmask 80896   ;;  %s665_s0 = inlined_call_operand.vmem [shape: f32[32,10], index: 0, kind: input, shape index: {}]   ;;  %s666_s1 = inlined_call_operand.vmem [shape: f32[32,10], index: 1, kind: input, shape index: {}]   ;;  %s667_s2 = inlined_call_operand.hbm [shape: f32[1,1,10], index: 2, kind: output, shape index: {0}]   ;;  %s668_s3 = inlined_call_operand.hbm [shape: f32[1,1,10], index: 3, kind: output, shape index: {1}]  }
   0x1   :  { %v503_v0 = vld [vmem:[%s665_s0] sm:$0xff]  ;;  %v508_v1 = vld [vmem:[%s665_s0 + $0x10] sm:$0xff]  ;;  %v67_v2 = vld [vmem:[%s665_s0 + $0x8] sm:$0xff] }
   0x2   :  { %v77_v3 = vsel %vm76_vm0, %v503_v0, -inf  ;;  %v83_v4 = vsel %vm76_vm0, %v508_v1, -inf  ;;  %v520_v5 = vld [vmem:[%s665_s0 + $0x18] sm:$0xff] }
   0x3   :  { %10 = vsyncpa [#allocation5], 0  ;;  %78 = vmax.xlane.f32.xlu0 %v77_v3  ;;  %84 = vmax.xlane.f32.xlu1 %v83_v4  ;;  %v80_v6 = vsel %vm76_vm0, %v67_v2, -inf  ;;  %v86_v7 = vsel %vm76_vm0, %v520_v5, -inf  ;;  %v74_v8 = vlaneseq  ;;  %v550_v28 = vld [vmem:[%s666_s1] sm:$0xff]  ;;  %v557_v32 = vld [vmem:[%s666_s1 + $0x10] sm:$0xff] }
   0x4   :  { %v241_v30 = vsel %vm76_vm0, %v550_v28, -inf  ;;  %v562_v33 = vld [vmem:[%s666_s1 + $0x8] sm:$0xff]  ;;  %v247_v34 = vsel %vm76_vm0, %v557_v32, -inf  ;;  %v571_v36 = vld [vmem:[%s666_s1 + $0x18] sm:$0xff]  ;;  %vm63_vm9 = vcmask 73728   ;;  %s478_s1 = smov [#allocation4]  }
   0x5   :  { %v525_v9 = vand.u32 127, %v74_v8  ;;  %v244_v35 = vsel %vm76_vm0, %v562_v33, -inf  ;;  %v250_v37 = vsel %vm76_vm0, %v571_v36, -inf  ;;  %s366_s27 = sshll.u32 %s478_s1, 4  ;;  %s367_s27 = int_to_ptr.vmem [resolvable:$true] %s366_s27 }
   0x6   :  { %s433_s28 = scalar_lea.vmem %s367_s27, 16  ;;  %s437_s29 = scalar_lea.vmem %s367_s27, 32 }
   0x7   :  { %81 = vmax.xlane.f32.xlu0 %v80_v6  ;;  %87 = vmax.xlane.f32.xlu1 %v86_v7  ;;  %p434_p0 = scmp.ne.s32.totalorder %s367_s27, %s433_s28  ;;  %p438_p1 = scmp.lt.s32.totalorder %s367_s27, %s367_s27 }
   0x8   :  { %p439_p2 = scmp.lt.s32.totalorder %s437_s29, %s433_s28 }
   0xa   :  { %p440_p3 = por %p439_p2, %p438_p1 }
   0xc   :  { %p441_p4 = pnand %p440_p3, %p434_p0 }
  0x8c   :  { %v527_v10 = vpop.xlane.xlu0 %78  ;;  %v529_v11 = vpop.xlane.xlu1 %84 }
  0x8d   :  { %vm121_vm1 = vcmp.eq.f32.partialorder %v503_v0, %v527_v10  ;;  %vm123_vm2 = vcmp.eq.f32.partialorder %v508_v1, %v529_v11  ;;  %v89_v53 = vsub.f32 %v503_v0, %v527_v10  ;;  %v91_v63 = vsub.f32 %v508_v1, %v529_v11 }
  0x8e   :  { %v125_v12 = vsel %vm121_vm1, %v525_v9, 10  ;;  %v127_v13 = vsel %vm123_vm2, %v525_v9, 10 }
  0x8f   :  { %v129_v14 = vsel %vm76_vm0, %v125_v12, 2147483647  ;;  %v159_v18 = vsel %vm76_vm0, %v127_v13, 2147483647  ;;  %v93_v60 = vmul.f32 1.442695, %v89_v53 }
  0x90   :  { %v82_v15 = vpop.xlane.xlu0 %81  ;;  %v538_v16 = vpop.xlane.xlu1 %87  ;;  %v131_v17 = vshra.s32 %v129_v14, 16  ;;  %v161_v22 = vshra.s32 %v159_v18, 16  ;;  %v130_v40 = vand.u32 65535, %v129_v14  ;;  %v160_v43 = vand.u32 65535, %v159_v18 }
  0x91   :  { %vm122_vm3 = vcmp.eq.f32.partialorder %v67_v2, %v82_v15  ;;  %vm124_vm4 = vcmp.eq.f32.partialorder %v520_v5, %v538_v16  ;;  %v90_v38 = vsub.f32 %v67_v2, %v82_v15  ;;  %v97_v7 = vmul.f32 1.442695, %v91_v63 }
  0x92   :  { %v126_v19 = vsel %vm122_vm3, %v525_v9, 10  ;;  %v133_v20 = vcvt.s32.f32 %v131_v17  ;;  %v128_v21 = vsel %vm124_vm4, %v525_v9, 10  ;;  %v163_v25 = vcvt.s32.f32 %v161_v22 }
  0x93   :  { %v144_v23 = vsel %vm76_vm0, %v126_v19, 2147483647  ;;  %v174_v24 = vsel %vm76_vm0, %v128_v21, 2147483647  ;;  %v95_v39 = vmul.f32 1.442695, %v90_v38  ;;  %v132_v42 = vcvt.s32.f32 %v130_v40 }
  0x94   :  { %134 = vmin.xlane.f32.xlu0 %v133_v20  ;;  %v146_v26 = vshra.s32 %v144_v23, 16  ;;  %v176_v27 = vshra.s32 %v174_v24, 16  ;;  %v145_v44 = vand.u32 65535, %v144_v23  ;;  %v162_v47 = vcvt.s32.f32 %v160_v43 }
  0x95   :  { %401 = vpow2.f32 %v95_v39  ;;  %v175_v50 = vand.u32 65535, %v174_v24  ;;  %v92_v8 = vsub.f32 %v520_v5, %v538_v16 }
  0x96   :  { %v148_v29 = vcvt.s32.f32 %v146_v26  ;;  %v178_v31 = vcvt.s32.f32 %v176_v27  ;;  %v147_v49 = vcvt.s32.f32 %v145_v44  ;;  %v477_v27 = vmov 0.0  }
  0x97   :  { %v177_v58 = vcvt.s32.f32 %v175_v50  ;;  %v99_v12 = vmul.f32 1.442695, %v92_v8  ;;  %64 = vst.msk [vmem:[#allocation2] sm:$0x1] %vm63_vm9, %v477_v27  ;;  %65 = vst.msk [vmem:[#allocation4] sm:$0x1] %vm63_vm9, %v477_v27 }
  0x98   :  { %164 = vmin.xlane.f32.xlu0 %v163_v25  ;;  %149 = vmin.xlane.f32.xlu1 %v148_v29 }
  0x9c   :  { %242 = vmax.xlane.f32.xlu0 %v241_v30  ;;  %179 = vmin.xlane.f32.xlu1 %v178_v31 }
  0xa0   :  { %248 = vmax.xlane.f32.xlu0 %v247_v34  ;;  %245 = vmax.xlane.f32.xlu1 %v244_v35 }
  0xa2   :  { %v402_v52 = vpop.eup %401 }
  0xa3   :  { %v104_v59 = vsel %vm76_vm0, %v402_v52, 0.0 }
  0xa4   :  { %251 = vmax.xlane.f32.xlu1 %v250_v37 }
 0x11d   :  { %v575_v41 = vpop.xlane.xlu0 %134 }
 0x11e   :  { %vm136_vm5 = vcmp.eq.f32.partialorder %v133_v20, %v575_v41 }
 0x11f   :  { %v137_v45 = vsel %vm136_vm5, %v132_v42, inf }
 0x120   :  { %138 = vmin.xlane.f32.xlu0 %v137_v45 }
 0x121   :  { %v578_v46 = vpop.xlane.xlu0 %164  ;;  %v580_v48 = vpop.xlane.xlu1 %149 }
 0x122   :  { %vm166_vm6 = vcmp.eq.f32.partialorder %v163_v25, %v578_v46  ;;  %vm151_vm7 = vcmp.eq.f32.partialorder %v148_v29, %v580_v48  ;;  %v141_v29 = vcvt.f32.s32 %v575_v41  ;;  %v171_v34 = vcvt.f32.s32 %v578_v46 }
 0x123   :  { %v167_v51 = vsel %vm166_vm6, %v162_v47, inf  ;;  %v152_v54 = vsel %vm151_vm7, %v147_v49, inf  ;;  %v156_v37 = vcvt.f32.s32 %v580_v48 }
 0x124   :  { %168 = vmin.xlane.f32.xlu0 %v167_v51  ;;  %153 = vmin.xlane.f32.xlu1 %v152_v54  ;;  %v172_v40 = vshll.u32 %v171_v34, 16 }
 0x125   :  { %v586_v55 = vpop.xlane.xlu0 %242  ;;  %v588_v56 = vpop.xlane.xlu1 %179  ;;  %v157_v44 = vshll.u32 %v156_v37, 16 }
 0x126   :  { %v253_v57 = vsub.f32 %v550_v28, %v586_v55  ;;  %vm181_vm8 = vcmp.eq.f32.partialorder %v178_v31, %v588_v56  ;;  %v142_v31 = vshll.u32 %v141_v29, 16  ;;  %v186_v45 = vcvt.f32.s32 %v588_v56 }
 0x127   :  { %v182_v62 = vsel %vm181_vm8, %v177_v58, inf }
 0x128   :  { %v257_v61 = vmul.f32 1.442695, %v253_v57  ;;  %105 = vadd.xlane.f32.xlu0 %v104_v59  ;;  %183 = vmin.xlane.f32.xlu1 %v182_v62  ;;  %v187_v52 = vshll.u32 %v186_v45, 16 }
 0x129   :  { %v596_v0 = vpop.xlane.xlu0 %248  ;;  %v598_v2 = vpop.xlane.xlu1 %245 }
 0x12a   :  { %403 = vpow2.f32 %v257_v61  ;;  %v255_v3 = vsub.f32 %v557_v32, %v596_v0  ;;  %v254_v4 = vsub.f32 %v562_v33, %v598_v2 }
 0x12b   :  { %405 = vpow2.f32 %v93_v60 }
 0x12c   :  { %v261_v6 = vmul.f32 1.442695, %v255_v3  ;;  %v259_v10 = vmul.f32 1.442695, %v254_v4 }
 0x12d   :  { %v606_v1 = vpop.xlane.xlu1 %251 }
 0x12e   :  { %407 = vpow2.f32 %v261_v6  ;;  %v256_v11 = vsub.f32 %v571_v36, %v606_v1 }
 0x12f   :  { %409 = vpow2.f32 %v259_v10 }
 0x130   :  { %411 = vpow2.f32 %v97_v7  ;;  %v263_v13 = vmul.f32 1.442695, %v256_v11 }
 0x132   :  { %413 = vpow2.f32 %v263_v13 }
 0x133   :  { %415 = vpow2.f32 %v99_v12 }
 0x137   :  { %v404_v14 = vpop.eup %403 }
 0x138   :  { %v265_v15 = vsel %vm76_vm0, %v404_v14, 0.0  ;;  %v406_v17 = vpop.eup %405 }
 0x139   :  { %266 = vadd.xlane.f32.xlu1 %v265_v15  ;;  %v101_v16 = vsel %vm76_vm0, %v406_v17, 0.0 }
 0x13b   :  { %v408_v18 = vpop.eup %407 }
 0x13c   :  { %v410_v5 = vpop.eup %409  ;;  %v271_v21 = vsel %vm76_vm0, %v408_v18, 0.0 }
 0x13d   :  { %v268_v19 = vsel %vm76_vm0, %v410_v5, 0.0  ;;  %102 = vadd.xlane.f32.xlu1 %v101_v16  ;;  %v412_v20 = vpop.eup %411 }
 0x13e   :  { %269 = vadd.xlane.f32.xlu0 %v268_v19  ;;  %v107_v23 = vsel %vm76_vm0, %v412_v20, 0.0 }
 0x13f   :  { %v414_v22 = vpop.eup %413 }
 0x140   :  { %v416_v24 = vpop.eup %415  ;;  %v274_v25 = vsel %vm76_vm0, %v414_v22, 0.0 }
 0x141   :  { %272 = vadd.xlane.f32.xlu1 %v271_v21  ;;  %v110_v26 = vsel %vm76_vm0, %v416_v24, 0.0 }
 0x142   :  { %108 = vadd.xlane.f32.xlu0 %v107_v23 }
 0x145   :  { %275 = vadd.xlane.f32.xlu1 %v274_v25 }
 0x146   :  { %111 = vadd.xlane.f32.xlu0 %v110_v26 }
 0x1a9   :  { %v139_v30 = vpop.xlane.xlu0 %138 }
 0x1aa   :  { %v140_v35 = vcvt.f32.s32 %v139_v30 }
 0x1ac   :  { %v143_v38 = vadd.s32 %v142_v31, %v140_v35 }
 0x1ad   :  { %v169_v39 = vpop.xlane.xlu0 %168  ;;  %v154_v42 = vpop.xlane.xlu1 %153 }
 0x1ae   :  { %v170_v43 = vcvt.f32.s32 %v169_v39  ;;  %vm229_vm10 = vcmp.eq.s32.totalorder %v525_v9, %v143_v38  ;;  %v155_v47 = vcvt.f32.s32 %v154_v42  ;;  %v347_v38 = vld [vmem:[#allocation4] sm:$0x1] }
 0x1af   :  { %v394_v41 = vsel %vm229_vm10, 1.0, %v477_v27 }
 0x1b0   :  { %v173_v49 = vadd.s32 %v172_v40, %v170_v43  ;;  %v289_v50 = vmul.f32 %v394_v41, %v550_v28  ;;  %v158_v46 = vadd.s32 %v157_v44, %v155_v47 }
 0x1b1   :  { %v184_v51 = vpop.xlane.xlu1 %183  ;;  %v106_v3 = vpop.xlane.xlu0 %105 }
 0x1b2   :  { %v293_v48 = vsel %vm76_vm0, %v289_v50, 0.0  ;;  %vm231_vm11 = vcmp.eq.s32.totalorder %v525_v9, %v173_v49  ;;  %v185_v53 = vcvt.f32.s32 %v184_v51  ;;  %vm230_vm12 = vcmp.eq.s32.totalorder %v525_v9, %v158_v46 }
 0x1b3   :  { %294 = vadd.xlane.f32.xlu0 %v293_v48  ;;  %v396_v54 = vsel %vm231_vm11, 1.0, %v477_v27  ;;  %v395_v56 = vsel %vm230_vm12, 1.0, %v477_v27  ;;  %417 = vrcp.f32 %v106_v3 }
 0x1b4   :  { %v291_v57 = vmul.f32 %v396_v54, %v557_v32  ;;  %v188_v58 = vadd.s32 %v187_v52, %v185_v53  ;;  %v290_v28 = vmul.f32 %v395_v56, %v562_v33 }
 0x1b6   :  { %v299_v59 = vsel %vm76_vm0, %v291_v57, 0.0  ;;  %v296_v60 = vsel %vm76_vm0, %v290_v28, 0.0  ;;  %vm232_vm13 = vcmp.eq.s32.totalorder %v525_v9, %v188_v58 }
 0x1b7   :  { %300 = vadd.xlane.f32.xlu0 %v299_v59  ;;  %297 = vadd.xlane.f32.xlu1 %v296_v60  ;;  %v397_v61 = vsel %vm232_vm13, 1.0, %v477_v27 }
 0x1b8   :  { %v292_v62 = vmul.f32 %v397_v61, %v571_v36 }
 0x1ba   :  { %v302_v63 = vsel %vm76_vm0, %v292_v62, 0.0 }
 0x1bb   :  { %303 = vadd.xlane.f32.xlu1 %v302_v63 }
 0x1c0   :  { %v418_v7 = vpop.eup %417 }
 0x1c1   :  { %vm190_vm14 = vcmp.gt.f32.partialorder %v418_v7, 0.99 }
 0x1c2   :  { %v267_v32 = vpop.xlane.xlu1 %266  ;;  %v391_v10 = vsel %vm190_vm14, 1.0, %v477_v27 }
 0x1c3   :  { %v226_v11 = vmul.f32 0.0, %v391_v10 }
 0x1c5   :  { %v310_v17 = vmul.f32 %v395_v56, %v226_v11 }
 0x1c6   :  { %v103_v4 = vpop.xlane.xlu1 %102 }
 0x1c7   :  { %419 = vrcp.f32 %v103_v4  ;;  %v270_v33 = vpop.xlane.xlu0 %269  ;;  %v331_v21 = vsel %vm76_vm0, %v310_v17, 0.0 }
 0x1cb   :  { %v109_v6 = vpop.xlane.xlu0 %108 }
 0x1cc   :  { %421 = vrcp.f32 %v109_v6 }
 0x1cf   :  { %v112_v8 = vpop.xlane.xlu0 %111 }
 0x1d0   :  { %423 = vrcp.f32 %v112_v8 }
 0x1d4   :  { %v420_v9 = vpop.eup %419 }
 0x1d5   :  { %vm189_vm15 = vcmp.gt.f32.partialorder %v420_v9, 0.99 }
 0x1d6   :  { %v390_v36 = vsel %vm189_vm15, 1.0, %v477_v27 }
 0x1d7   :  { %v309_v13 = vmul.f32 %v394_v41, %v390_v36 }
 0x1d9   :  { %v422_v12 = vpop.eup %421  ;;  %v330_v5 = vsel %vm76_vm0, %v309_v13, 0.0 }
 0x1da   :  { %vm191_vm1 = vcmp.gt.f32.partialorder %v422_v12, 0.99  ;;  %v332_v23 = vadd.f32 %v331_v21, %v330_v5 }
 0x1db   :  { %v392_v14 = vsel %vm191_vm1, 1.0, %v477_v27 }
 0x1dc   :  { %v227_v15 = vmul.f32 0.0, %v392_v14 }
 0x1dd   :  { %v424_v18 = vpop.eup %423 }
 0x1de   :  { %vm192_vm2 = vcmp.gt.f32.partialorder %v424_v18, 0.99  ;;  %v311_v16 = vmul.f32 %v396_v54, %v227_v15 }
 0x1df   :  { %v393_v19 = vsel %vm192_vm2, 1.0, %v477_v27 }
 0x1e0   :  { %v228_v20 = vmul.f32 0.0, %v393_v19  ;;  %v333_v22 = vsel %vm76_vm0, %v311_v16, 0.0 }
 0x1e1   :  { %v334_v25 = vadd.f32 %v333_v22, %v332_v23 }
 0x1e2   :  { %v312_v24 = vmul.f32 %v397_v61, %v228_v20 }
 0x1e4   :  { %v335_v26 = vsel %vm76_vm0, %v312_v24, 0.0 }
 0x1e5   :  { %v336_v29 = vadd.f32 %v335_v26, %v334_v25 }
 0x1e7   :  { %v337_v30 = vrot.slane %v336_v29, 4 }
 0x1e9   :  { %v338_v31 = vadd.f32 %v337_v30, %v336_v29 }
 0x1eb   :  { %v339_v34 = vrot.slane %v338_v31, 2 }
 0x1ed   :  { %v340_v35 = vadd.f32 %v339_v34, %v338_v31 }
 0x1ef   :  { %v341_v37 = vrot.slane %v340_v35, 1 }
 0x1f1   :  { %v342_v27 = vadd.f32 %v341_v37, %v340_v35 }
 0x1f3   :  { %v348_v39 = vadd.f32 %v347_v38, %v342_v27 }
 0x1f5   :  { %349 = vst.msk [vmem:[#allocation4] sm:$0x1] %vm63_vm9, %v348_v39 }
 0x1f6   :  { %444 = shalt.err (!%p441_p4)
}
 0x1f7   :  { %369 = dma.vmem_to_hbm [thread:$0]  %s367_s27, 16, %s668_s3, [#allocation5]   ;;  %v273_v40 = vpop.xlane.xlu1 %272  ;;  %425 = vlog2.f32 %v267_v32 }
 0x1f8   :  { %427 = vlog2.f32 %v273_v40  ;;  %s479_s3 = smov [#allocation2]  }
 0x1f9   :  { %429 = vlog2.f32 %v270_v33  ;;  %s356_s5 = sshll.u32 %s479_s3, 4  ;;  %s357_s5 = int_to_ptr.vmem [resolvable:$true] %s356_s5 }
 0x1fa   :  { %s453_s6 = scalar_lea.vmem %s357_s5, 16  ;;  %s457_s7 = scalar_lea.vmem %s357_s5, 32 }
 0x1fb   :  { %v276_v42 = vpop.xlane.xlu1 %275  ;;  %p454_p5 = scmp.ne.s32.totalorder %s357_s5, %s453_s6  ;;  %p458_p6 = scmp.lt.s32.totalorder %s357_s5, %s357_s5 }
 0x1fc   :  { %431 = vlog2.f32 %v276_v42  ;;  %p459_p7 = scmp.lt.s32.totalorder %s457_s7, %s453_s6 }
 0x1fe   :  { %p460_p8 = por %p459_p7, %p458_p6 }
 0x200   :  { %p461_p9 = pnand %p460_p8, %p454_p5 }
 0x204   :  { %v426_v43 = vpop.eup %425 }
 0x205   :  { %v428_v44 = vpop.eup %427  ;;  %v278_v45 = vmul.f32 0.6931472, %v426_v43 }
 0x206   :  { %v430_v47 = vpop.eup %429  ;;  %v282_v41 = vmul.f32 0.6931472, %v428_v44 }
 0x207   :  { %v280_v49 = vmul.f32 0.6931472, %v430_v47  ;;  %v285_v50 = vadd.f32 %v278_v45, %v586_v55 }
 0x208   :  { %v287_v52 = vadd.f32 %v282_v41, %v596_v0 }
 0x209   :  { %v432_v51 = vpop.eup %431  ;;  %v286_v54 = vadd.f32 %v280_v49, %v598_v2 }
 0x20a   :  { %v284_v53 = vmul.f32 0.6931472, %v432_v51 }
 0x20c   :  { %v288_v62 = vadd.f32 %v284_v53, %v606_v1  ;;  %v343_v1 = vld [vmem:[#allocation2] sm:$0x1] }
 0x23c   :  { %v295_v46 = vpop.xlane.xlu0 %294 }
 0x23d   :  { %v305_v48 = vsub.f32 %v285_v50, %v295_v46 }
 0x23f   :  { %v313_v28 = vmul.f32 %v309_v13, %v305_v48 }
 0x240   :  { %v301_v56 = vpop.xlane.xlu0 %300  ;;  %v298_v57 = vpop.xlane.xlu1 %297 }
 0x241   :  { %v307_v58 = vsub.f32 %v287_v52, %v301_v56  ;;  %v306_v59 = vsub.f32 %v286_v54, %v298_v57  ;;  %v317_v55 = vsel %vm76_vm0, %v313_v28, 0.0 }
 0x243   :  { %v314_v60 = vmul.f32 %v310_v17, %v306_v59  ;;  %v315_v61 = vmul.f32 %v311_v16, %v307_v58 }
 0x244   :  { %v304_v63 = vpop.xlane.xlu1 %303 }
 0x245   :  { %v318_v3 = vsel %vm76_vm0, %v314_v60, 0.0  ;;  %v308_v32 = vsub.f32 %v288_v62, %v304_v63  ;;  %v320_v0 = vsel %vm76_vm0, %v315_v61, 0.0 }
 0x246   :  { %v319_v4 = vadd.f32 %v318_v3, %v317_v55 }
 0x247   :  { %v316_v33 = vmul.f32 %v312_v24, %v308_v32 }
 0x248   :  { %v321_v2 = vadd.f32 %v320_v0, %v319_v4 }
 0x249   :  { %v322_v6 = vsel %vm76_vm0, %v316_v33, 0.0 }
 0x24a   :  { %v323_v7 = vadd.f32 %v322_v6, %v321_v2 }
 0x24c   :  { %v324_v8 = vrot.slane %v323_v7, 4 }
 0x24e   :  { %v325_v9 = vadd.f32 %v324_v8, %v323_v7 }
 0x250   :  { %v326_v10 = vrot.slane %v325_v9, 2 }
 0x252   :  { %v327_v36 = vadd.f32 %v326_v10, %v325_v9 }
 0x254   :  { %v328_v11 = vrot.slane %v327_v36, 1 }
 0x256   :  { %v329_v12 = vadd.f32 %v328_v11, %v327_v36 }
 0x258   :  { %v344_v13 = vadd.f32 %v343_v1, %v329_v12 }
 0x25a   :  { %346 = vst.msk [vmem:[#allocation2] sm:$0x1] %vm63_vm9, %v344_v13 }
 0x25b   :  { %464 = shalt.err (!%p461_p9)
}
 0x25c   :  { %359 = dma.vmem_to_hbm [thread:$0]  %s357_s5, 16, %s667_s2, [#allocation3]  }
 0x25d   :  { %473 = dma.done.wait [#allocation3], 16  }
 0x25e   :  { %474 = vsyncadd [#allocation3], 4294967280 }
 0x25f   :  { %475 = dma.done.wait [#allocation5], 16  }
 0x260   :  { %476 = vsyncadd [#allocation5], 4294967280 }
 0x261   :  { %376 = vsyncpa [#allocation3], 1 }
 0x262   :  { %377 = vsyncpa [#allocation5], 1 }

</bundles_post_ra>
